<compile_context>
chip_gen: v7x
topology: tpu7x:2x2x1
jax: 0.10.0
libtpu: 0.0.40
codegen_flags: <defaults>
</compile_context>

<pallas_src>
import functools

import jax
import jax.numpy as jnp
from jax.experimental import pallas as pl
from jax.experimental.pallas import tpu as pltpu


def _gff_kernel(*refs, W, tH, n_tiles, pad_top, halo_w):
    """One (batch b, row-tile t) grid step.

    refs (n_tiles > 1):
      xb_ref   : (1, C, L)       x rows [t*tH, (t+1)*tH), flattened, pixels on lanes
      xtop_ref : (1, C, halo_w)  aligned window whose last W lanes are x row t*tH - 1
      xbot_ref : (1, C, halo_w)  aligned window whose first W lanes are x row (t+1)*tH
      m_ref    : (2, L)          [m_left; m_right] column-edge masks (f32)
      w_in_ref : (2C, C)         project_in weight (bf16)
      w_dw_ref : (2C, 9)         depthwise taps, tap k = (dy+1)*3 + (dx+1) (f32)
      w_out_ref: (C, C)          project_out weight (bf16)
      o_ref    : (1, C, L)       output tile
      y_ref    : (2C, pad_top + (tH+2)*W) f32 scratch; flat idx = pad_top + (r+1)*W + c
    refs (n_tiles == 1): the same minus xtop_ref / xbot_ref.
    """
    if n_tiles > 1:
        (xb_ref, xtop_ref, xbot_ref, m_ref, w_in_ref, w_dw_ref, w_out_ref,
         o_ref, y_ref) = refs
    else:
        xb_ref, m_ref, w_in_ref, w_dw_ref, w_out_ref, o_ref, y_ref = refs
        xtop_ref = xbot_ref = None

    C2 = w_in_ref.shape[0]                      # 2C
    C = w_out_ref.shape[0]
    L = tH * W
    t = pl.program_id(1)
    f32 = jnp.float32
    bf16 = jnp.bfloat16

    w_in = w_in_ref[...]                        # (2C, C) bf16

    # Static, 128-aligned-by-construction offsets (Python ints -> no hints needed).
    body_dst = pad_top + W
    bot_dst = pad_top + (tH + 1) * W

    # ---- project_in (1x1 conv) on the body rows: lane-dense bf16 MXU matmul with f32
    #      accumulation, stored to scratch at a 128-aligned offset (unmasked stores).
    xb = xb_ref[0].astype(bf16)                                          # (C, L)
    y_ref[:, pl.ds(body_dst, L)] = jnp.dot(w_in, xb, preferred_element_type=f32)

    # ---- halo rows: re-apply project_in to the row above/below the slab, or write the
    #      image-edge zero padding (zero padding commutes with the bias-free pointwise
    #      project_in).  Only these tiny W-lane windows are ever zeroed; every other
    #      read region below is overwritten in-step and the pad lanes are never read.
    if n_tiles > 1:
        @pl.when(t > 0)
        def _():
            xt = xtop_ref[0, :, halo_w - W:].astype(bf16)                # (C, W)
            y_ref[:, pl.ds(pad_top, W)] = jnp.dot(w_in, xt, preferred_element_type=f32)

        @pl.when(t == 0)
        def _():
            y_ref[:, pl.ds(pad_top, W)] = jnp.zeros((C2, W), f32)

        @pl.when(t < n_tiles - 1)
        def _():
            xbo = xbot_ref[0, :, :W].astype(bf16)                        # (C, W)
            y_ref[:, pl.ds(bot_dst, W)] = jnp.dot(w_in, xbo, preferred_element_type=f32)

        @pl.when(t == n_tiles - 1)
        def _():
            y_ref[:, pl.ds(bot_dst, W)] = jnp.zeros((C2, W), f32)
    else:
        y_ref[:, pl.ds(pad_top, W)] = jnp.zeros((C2, W), f32)
        y_ref[:, pl.ds(bot_dst, W)] = jnp.zeros((C2, W), f32)

    # ---- depthwise 3x3 (padding=1), both channel halves fused into one (2C, L) pass.
    # Each dy row is read once; the per-channel tap weights commute with lane rotation,
    # so the dx = -1 / +1 taps are two pltpu.roll's (XLU slot) on the dy-accumulated
    # rows, and the column masks zero exactly the wrapped lanes (the W-direction pad).
    w_dw = w_dw_ref[...]                        # (2C, 9) f32
    masks = m_ref[...]                          # (2, L) f32
    m_left = masks[0:1, :]
    m_right = masks[1:2, :]

    acc_c = acc_l = acc_r = None
    for dy in (-1, 0, 1):
        row = y_ref[:, pl.ds(body_dst + dy * W, L)]                      # (2C, L) f32
        kl, kc, kr = (dy + 1) * 3 + 0, (dy + 1) * 3 + 1, (dy + 1) * 3 + 2
        sc = row * w_dw[:, kc:kc + 1]
        sl = row * w_dw[:, kl:kl + 1]
        sr = row * w_dw[:, kr:kr + 1]
        acc_c = sc if acc_c is None else acc_c + sc
        acc_l = sl if acc_l is None else acc_l + sl
        acc_r = sr if acc_r is None else acc_r + sr

    y_dw = (acc_c
            + pltpu.roll(acc_l, 1, axis=1) * m_left          # dx = -1 taps
            + pltpu.roll(acc_r, L - 1, axis=1) * m_right)    # dx = +1 taps

    # ---- gelu(x1) * x2 gating (exact erf GELU = torch default) + project_out.
    x1 = y_dw[:C]
    x2 = y_dw[C:]
    gated = 0.5 * x1 * (1.0 + jax.lax.erf(x1 * f32(0.7071067811865476))) * x2
    out = jnp.dot(w_out_ref[...], gated.astype(bf16), preferred_element_type=f32)
    o_ref[0] = out.astype(o_ref.dtype)


def _pick_row_tile(H, W):
    """Largest tH dividing H with tH*W a lane-aligned tile of <= 2048 lanes."""
    if W % 128 == 0:
        base = 1
    elif W <= 128 and 128 % W == 0:
        base = 128 // W
    else:
        return H                                   # no clean lane-dense tiling: one tile
    cands = [m for m in range(base, H + 1, base) if H % m == 0]
    if not cands:
        return H
    proper = [m for m in cands if m < H] or cands  # prefer >1 tile (pipeline / megacore)
    small = [m for m in proper if m * W <= 2048]   # cap per-step lanes (VMEM + halo %)
    return small[-1] if small else proper[0]


@functools.partial(jax.jit, static_argnames=("row_tile",))
def gated_feed_forward(x_nchw, w_project_in, w_dwconv, w_project_out, *, row_tile=None):
    """Pallas implementation of GatedFeedForward.forward (NCHW in / NCHW out)."""
    B, C, H, W = x_nchw.shape
    HW = H * W

    tH = row_tile if row_tile is not None else _pick_row_tile(H, W)
    assert H % tH == 0, "row_tile must divide H"
    nt = H // tH
    L = tH * W

    if nt > 1:
        assert L % 128 == 0 and (W % 128 == 0 or (W <= 128 and 128 % W == 0)), (
            "tiled path needs lane-aligned row tiles; use row_tile=None")
        halo_w = W if W % 128 == 0 else 128
    else:
        halo_w = L
    pad_top = (-W) % 128                            # keeps the body region 128-aligned
    buf_len = pad_top + (tH + 2) * W

    # NCHW with spatial dims flattened: contiguous reshape, no transpose.
    x_flat = x_nchw.reshape(B, C, HW)

    # Re-pack torch Conv2d weights (tiny one-time glue); MXU weights in bf16.
    w_in = w_project_in[:, :, 0, 0].astype(jnp.bfloat16)            # (2C, C)
    w_dw = w_dwconv[:, 0, :, :].reshape(2 * C, 9).astype(jnp.float32)
    w_out = w_project_out[:, :, 0, 0].astype(jnp.bfloat16)          # (C, C)

    # Column-edge masks for the flattened W-direction zero padding (resident input).
    col = jnp.arange(L, dtype=jnp.int32) % W
    masks = jnp.stack([col > 0, col < W - 1]).astype(jnp.float32)   # (2, L)

    body_spec = pl.BlockSpec((1, C, L), lambda b, t: (b, 0, t))

    def const_spec(shape):
        return pl.BlockSpec(shape, lambda b, t: (0,) * len(shape))

    in_specs = [body_spec]
    args = [x_flat]
    if nt > 1:
        lb = L // halo_w
        n_hblocks = HW // halo_w
        in_specs += [
            pl.BlockSpec((1, C, halo_w),
                         lambda b, t: (b, 0, jnp.maximum(t * lb - 1, 0))),
            pl.BlockSpec((1, C, halo_w),
                         lambda b, t: (b, 0, jnp.minimum((t + 1) * lb, n_hblocks - 1))),
        ]
        args += [x_flat, x_flat]
    in_specs += [const_spec((2, L)), const_spec((2 * C, C)),
                 const_spec((2 * C, 9)), const_spec((C, C))]
    args += [masks, w_in, w_dw, w_out]

    kernel = functools.partial(_gff_kernel, W=W, tH=tH, n_tiles=nt,
                               pad_top=pad_top, halo_w=halo_w)

    out_flat = pl.pallas_call(
        kernel,
        out_shape=jax.ShapeDtypeStruct((B, C, HW), x_nchw.dtype),
        grid_spec=pltpu.PrefetchScalarGridSpec(
            num_scalar_prefetch=0,
            grid=(B, nt),
            in_specs=in_specs,
            out_specs=pl.BlockSpec((1, C, L), lambda b, t: (b, 0, t)),
            scratch_shapes=[pltpu.VMEM((2 * C, buf_len), jnp.float32)],
        ),
        compiler_params=pltpu.CompilerParams(
            dimension_semantics=("parallel", "parallel"),
            vmem_limit_bytes=32 * 1024 * 1024,   # explicit; under v7x's 64 MiB physical
        ),
    )(*args)

    return out_flat.reshape(B, C, H, W)


def _reference(x_nchw, w_project_in, w_dwconv, w_project_out):
    """Pure-JAX f32 reference mirroring the torch module (NCHW convs)."""
    C = x_nchw.shape[1]
    dn = jax.lax.conv_dimension_numbers(x_nchw.shape, w_project_in.shape,
                                        ("NCHW", "OIHW", "NCHW"))
    y = jax.lax.conv_general_dilated(x_nchw, w_project_in, (1, 1), "VALID",
                                     dimension_numbers=dn)
    y = jax.lax.conv_general_dilated(y, w_dwconv, (1, 1), ((1, 1), (1, 1)),
                                     dimension_numbers=dn,
                                     feature_group_count=2 * C)
    x1, x2 = y[:, :C], y[:, C:]
    g = jax.nn.gelu(x1, approximate=False) * x2
    return jax.lax.conv_general_dilated(g, w_project_out, (1, 1), "VALID",
                                        dimension_numbers=dn)


if __name__ == "__main__":
    B, C, H, W = 2, 4, 32, 16          # dim=4; H=32 so row tiling has interior tiles

    key = jax.random.PRNGKey(0)
    k_x, k_in, k_dw, k_out = jax.random.split(key, 4)

    x = jax.random.normal(k_x, (B, C, H, W), dtype=jnp.float32)
    w_project_in = jax.random.normal(k_in, (2 * C, C, 1, 1), dtype=jnp.float32) * 0.2
    w_dwconv = jax.random.normal(k_dw, (2 * C, 1, 3, 3), dtype=jnp.float32) * 0.2
    w_project_out = jax.random.normal(k_out, (C, C, 1, 1), dtype=jnp.float32) * 0.2

    ref = jax.block_until_ready(_reference(x, w_project_in, w_dwconv, w_project_out))

    # bf16 MXU operands -> loosened tolerance vs the f32 reference.
    TOL = dict(atol=1e-2, rtol=1e-2)

    # Small explicit row tile -> grid (B, 4): exercises top-edge, interior and
    # bottom-edge halo paths.
    out = gated_feed_forward(x, w_project_in, w_dwconv, w_project_out, row_tile=8)
    out = jax.block_until_ready(out)
    assert out.shape == (B, C, H, W)
    assert jnp.allclose(out, ref, **TOL)

    # Default heuristic tile choice (tH=16 here, grid (B, 2)).
    out2 = gated_feed_forward(x, w_project_in, w_dwconv, w_project_out)
    out2 = jax.block_until_ready(out2)
    assert jnp.allclose(out2, ref, **TOL)

    # Single-tile path (no halo inputs bound at all).
    out3 = gated_feed_forward(x, w_project_in, w_dwconv, w_project_out, row_tile=H)
    out3 = jax.block_until_ready(out3)
    assert jnp.allclose(out3, ref, **TOL)

    print("KERNEL_OK")
</pallas_src>

<mosaic_0001>
module attributes {stable_mosaic.version = 11 : i64} {
  func.func @_gff_kernel(%arg0: i32, %arg1: i32, %arg2: memref<1x4x128xf32, #tpu.memory_space<vmem>>, %arg3: memref<1x4x128xf32, #tpu.memory_space<vmem>>, %arg4: memref<1x4x128xf32, #tpu.memory_space<vmem>>, %arg5: memref<2x128xf32, #tpu.memory_space<vmem>>, %arg6: memref<8x4xbf16, #tpu.memory_space<vmem>>, %arg7: memref<8x9xf32, #tpu.memory_space<vmem>>, %arg8: memref<4x4xbf16, #tpu.memory_space<vmem>>, %arg9: memref<1x4x128xf32, #tpu.memory_space<vmem>>, %arg10: memref<8x272xf32, #tpu.memory_space<vmem>>) attributes {dimension_semantics = [#tpu.dimension_semantics<parallel>, #tpu.dimension_semantics<parallel>], iteration_bounds = array<i64: 2, 4>, scalar_prefetch = 0 : i64, scratch_operands = 1 : i64, tpu.core_type = #tpu.core_type<tc>, window_params = [{transform_indices = @transform_0, window_bounds = array<i64: 1, 4, 128>}, {transform_indices = @transform_1, window_bounds = array<i64: 1, 4, 128>}, {transform_indices = @transform_2, window_bounds = array<i64: 1, 4, 128>}, {pipeline_mode = #tpu.pipeline_mode<synchronous>, transform_indices = @transform_3, window_bounds = array<i64: 2, 128>}, {pipeline_mode = #tpu.pipeline_mode<synchronous>, transform_indices = @transform_4, window_bounds = array<i64: 8, 4>}, {pipeline_mode = #tpu.pipeline_mode<synchronous>, transform_indices = @transform_5, window_bounds = array<i64: 8, 9>}, {pipeline_mode = #tpu.pipeline_mode<synchronous>, transform_indices = @transform_6, window_bounds = array<i64: 4, 4>}, {transform_indices = @transform_7, window_bounds = array<i64: 1, 4, 128>}]} {
    %c0 = arith.constant 0 : index
    %c0_0 = arith.constant 0 : index
    %0 = vector.load %arg6[%c0, %c0_0] : memref<8x4xbf16, #tpu.memory_space<vmem>>, vector<8x4xbf16>
    %c0_1 = arith.constant 0 : index
    %c0_2 = arith.constant 0 : index
    %c0_3 = arith.constant 0 : index
    %1 = vector.load %arg2[%c0_1, %c0_2, %c0_3] : memref<1x4x128xf32, #tpu.memory_space<vmem>>, vector<1x4x128xf32>
    %2 = vector.shape_cast %1 : vector<1x4x128xf32> to vector<4x128xf32>
    %3 = arith.truncf %2 : vector<4x128xf32> to vector<4x128xbf16>
    %cst = arith.constant dense<0.000000e+00> : vector<8x128xf32>
    %4 = tpu.matmul %0, %3, %cst {dimension_numbers = #tpu.dot_dimension_numbers<[1], [0], [0], [1], [0, 0, 1, 1], [], []>} : vector<8x4xbf16>, vector<4x128xbf16>, vector<8x128xf32> -> vector<8x128xf32>
    %c0_4 = arith.constant 0 : index
    %c128 = arith.constant 128 : index
    %5 = vector.load %arg10[%c0_4, %c128] : memref<8x272xf32, #tpu.memory_space<vmem>>, vector<8x128xf32>
    tpu.vector_store %arg10[%c0_4, %c128], %4 {strides = array<i32>} : memref<8x272xf32, #tpu.memory_space<vmem>>, vector<8x128xf32>,
    %c0_i32 = arith.constant 0 : i32
    %6 = arith.cmpi sgt, %arg1, %c0_i32 : i32
    %7 = arith.extui %6 : i1 to i32
    %c0_i32_5 = arith.constant 0 : i32
    %8 = arith.cmpi ne, %7, %c0_i32_5 : i32
    scf.if %8 {
      %c0_28 = arith.constant 0 : index
      %c0_29 = arith.constant 0 : index
      %c112_30 = arith.constant 112 : index
      %83 = vector.load %arg3[%c0_28, %c0_29, %c112_30] : memref<1x4x128xf32, #tpu.memory_space<vmem>>, vector<1x4x16xf32>
      %84 = vector.shape_cast %83 : vector<1x4x16xf32> to vector<4x16xf32>
      %85 = arith.truncf %84 : vector<4x16xf32> to vector<4x16xbf16>
      %cst_31 = arith.constant dense<0.000000e+00> : vector<8x16xf32>
      %86 = tpu.matmul %0, %85, %cst_31 {dimension_numbers = #tpu.dot_dimension_numbers<[1], [0], [0], [1], [0, 0, 1, 1], [], []>} : vector<8x4xbf16>, vector<4x16xbf16>, vector<8x16xf32> -> vector<8x16xf32>
      %c0_32 = arith.constant 0 : index
      %c112_33 = arith.constant 112 : index
      %87 = vector.load %arg10[%c0_32, %c112_33] : memref<8x272xf32, #tpu.memory_space<vmem>>, vector<8x16xf32>
      tpu.vector_store %arg10[%c0_32, %c112_33], %86 {strides = array<i32>} : memref<8x272xf32, #tpu.memory_space<vmem>>, vector<8x16xf32>,
    } else {
    }
    %c0_i32_6 = arith.constant 0 : i32
    %9 = arith.cmpi eq, %arg1, %c0_i32_6 : i32
    %10 = arith.extui %9 : i1 to i32
    %c0_i32_7 = arith.constant 0 : i32
    %11 = arith.cmpi ne, %10, %c0_i32_7 : i32
    scf.if %11 {
      %cst_28 = arith.constant 0.000000e+00 : f32
      %83 = vector.broadcast %cst_28 : f32 to vector<8x16xf32>
      %c0_29 = arith.constant 0 : index
      %c112_30 = arith.constant 112 : index
      %84 = vector.load %arg10[%c0_29, %c112_30] : memref<8x272xf32, #tpu.memory_space<vmem>>, vector<8x16xf32>
      tpu.vector_store %arg10[%c0_29, %c112_30], %83 {strides = array<i32>} : memref<8x272xf32, #tpu.memory_space<vmem>>, vector<8x16xf32>,
    } else {
    }
    %c3_i32 = arith.constant 3 : i32
    %12 = arith.cmpi slt, %arg1, %c3_i32 : i32
    %13 = arith.extui %12 : i1 to i32
    %c0_i32_8 = arith.constant 0 : i32
    %14 = arith.cmpi ne, %13, %c0_i32_8 : i32
    scf.if %14 {
      %c0_28 = arith.constant 0 : index
      %c0_29 = arith.constant 0 : index
      %c0_30 = arith.constant 0 : index
      %83 = vector.load %arg4[%c0_28, %c0_29, %c0_30] : memref<1x4x128xf32, #tpu.memory_space<vmem>>, vector<1x4x16xf32>
      %84 = vector.shape_cast %83 : vector<1x4x16xf32> to vector<4x16xf32>
      %85 = arith.truncf %84 : vector<4x16xf32> to vector<4x16xbf16>
      %cst_31 = arith.constant dense<0.000000e+00> : vector<8x16xf32>
      %86 = tpu.matmul %0, %85, %cst_31 {dimension_numbers = #tpu.dot_dimension_numbers<[1], [0], [0], [1], [0, 0, 1, 1], [], []>} : vector<8x4xbf16>, vector<4x16xbf16>, vector<8x16xf32> -> vector<8x16xf32>
      %c0_32 = arith.constant 0 : index
      %c256 = arith.constant 256 : index
      %87 = vector.load %arg10[%c0_32, %c256] : memref<8x272xf32, #tpu.memory_space<vmem>>, vector<8x16xf32>
      tpu.vector_store %arg10[%c0_32, %c256], %86 {strides = array<i32>} : memref<8x272xf32, #tpu.memory_space<vmem>>, vector<8x16xf32>,
    } else {
    }
    %c3_i32_9 = arith.constant 3 : i32
    %15 = arith.cmpi eq, %arg1, %c3_i32_9 : i32
    %16 = arith.extui %15 : i1 to i32
    %c0_i32_10 = arith.constant 0 : i32
    %17 = arith.cmpi ne, %16, %c0_i32_10 : i32
    scf.if %17 {
      %cst_28 = arith.constant 0.000000e+00 : f32
      %83 = vector.broadcast %cst_28 : f32 to vector<8x16xf32>
      %c0_29 = arith.constant 0 : index
      %c256 = arith.constant 256 : index
      %84 = vector.load %arg10[%c0_29, %c256] : memref<8x272xf32, #tpu.memory_space<vmem>>, vector<8x16xf32>
      tpu.vector_store %arg10[%c0_29, %c256], %83 {strides = array<i32>} : memref<8x272xf32, #tpu.memory_space<vmem>>, vector<8x16xf32>,
    } else {
    }
    %c0_11 = arith.constant 0 : index
    %c0_12 = arith.constant 0 : index
    %18 = vector.load %arg7[%c0_11, %c0_12] : memref<8x9xf32, #tpu.memory_space<vmem>>, vector<8x9xf32>
    %c0_13 = arith.constant 0 : index
    %c0_14 = arith.constant 0 : index
    %19 = vector.load %arg5[%c0_13, %c0_14] : memref<2x128xf32, #tpu.memory_space<vmem>>, vector<2x128xf32>
    %20 = vector.extract_strided_slice %19 {offsets = [0, 0], sizes = [1, 128], strides = [1, 1]} : vector<2x128xf32> to vector<1x128xf32>
    %21 = vector.extract_strided_slice %19 {offsets = [1, 0], sizes = [1, 128], strides = [1, 1]} : vector<2x128xf32> to vector<1x128xf32>
    %c0_15 = arith.constant 0 : index
    %c112 = arith.constant 112 : index
    %22 = vector.load %arg10[%c0_15, %c112] : memref<8x272xf32, #tpu.memory_space<vmem>>, vector<8x128xf32>
    %23 = vector.extract_strided_slice %18 {offsets = [0, 1], sizes = [8, 1], strides = [1, 1]} : vector<8x9xf32> to vector<8x1xf32>
    %24 = vector.broadcast %23 : vector<8x1xf32> to vector<8x128xf32>
    %25 = arith.mulf %22, %24 : vector<8x128xf32>
    %26 = vector.extract_strided_slice %18 {offsets = [0, 0], sizes = [8, 1], strides = [1, 1]} : vector<8x9xf32> to vector<8x1xf32>
    %27 = vector.broadcast %26 : vector<8x1xf32> to vector<8x128xf32>
    %28 = arith.mulf %22, %27 : vector<8x128xf32>
    %29 = vector.extract_strided_slice %18 {offsets = [0, 2], sizes = [8, 1], strides = [1, 1]} : vector<8x9xf32> to vector<8x1xf32>
    %30 = vector.broadcast %29 : vector<8x1xf32> to vector<8x128xf32>
    %31 = arith.mulf %22, %30 : vector<8x128xf32>
    %c0_16 = arith.constant 0 : index
    %c128_17 = arith.constant 128 : index
    %32 = vector.load %arg10[%c0_16, %c128_17] : memref<8x272xf32, #tpu.memory_space<vmem>>, vector<8x128xf32>
    %33 = vector.extract_strided_slice %18 {offsets = [0, 4], sizes = [8, 1], strides = [1, 1]} : vector<8x9xf32> to vector<8x1xf32>
    %34 = vector.broadcast %33 : vector<8x1xf32> to vector<8x128xf32>
    %35 = arith.mulf %32, %34 : vector<8x128xf32>
    %36 = vector.extract_strided_slice %18 {offsets = [0, 3], sizes = [8, 1], strides = [1, 1]} : vector<8x9xf32> to vector<8x1xf32>
    %37 = vector.broadcast %36 : vector<8x1xf32> to vector<8x128xf32>
    %38 = arith.mulf %32, %37 : vector<8x128xf32>
    %39 = vector.extract_strided_slice %18 {offsets = [0, 5], sizes = [8, 1], strides = [1, 1]} : vector<8x9xf32> to vector<8x1xf32>
    %40 = vector.broadcast %39 : vector<8x1xf32> to vector<8x128xf32>
    %41 = arith.mulf %32, %40 : vector<8x128xf32>
    %42 = arith.addf %25, %35 : vector<8x128xf32>
    %43 = arith.addf %28, %38 : vector<8x128xf32>
    %44 = arith.addf %31, %41 : vector<8x128xf32>
    %c0_18 = arith.constant 0 : index
    %c144 = arith.constant 144 : index
    %45 = vector.load %arg10[%c0_18, %c144] : memref<8x272xf32, #tpu.memory_space<vmem>>, vector<8x128xf32>
    %46 = vector.extract_strided_slice %18 {offsets = [0, 7], sizes = [8, 1], strides = [1, 1]} : vector<8x9xf32> to vector<8x1xf32>
    %47 = vector.broadcast %46 : vector<8x1xf32> to vector<8x128xf32>
    %48 = arith.mulf %45, %47 : vector<8x128xf32>
    %49 = vector.extract_strided_slice %18 {offsets = [0, 6], sizes = [8, 1], strides = [1, 1]} : vector<8x9xf32> to vector<8x1xf32>
    %50 = vector.broadcast %49 : vector<8x1xf32> to vector<8x128xf32>
    %51 = arith.mulf %45, %50 : vector<8x128xf32>
    %52 = vector.extract_strided_slice %18 {offsets = [0, 8], sizes = [8, 1], strides = [1, 1]} : vector<8x9xf32> to vector<8x1xf32>
    %53 = vector.broadcast %52 : vector<8x1xf32> to vector<8x128xf32>
    %54 = arith.mulf %45, %53 : vector<8x128xf32>
    %55 = arith.addf %42, %48 : vector<8x128xf32>
    %56 = arith.addf %43, %51 : vector<8x128xf32>
    %57 = arith.addf %44, %54 : vector<8x128xf32>
    %c1_i32 = arith.constant 1 : i32
    %58 = tpu.dynamic_rotate %56 by %c1_i32 dim 1 : vector<8x128xf32>, i32 -> vector<8x128xf32>
    %59 = vector.broadcast %20 : vector<1x128xf32> to vector<8x128xf32>
    %60 = arith.mulf %58, %59 : vector<8x128xf32>
    %61 = arith.addf %55, %60 : vector<8x128xf32>
    %c127_i32 = arith.constant 127 : i32
    %62 = tpu.dynamic_rotate %57 by %c127_i32 dim 1 : vector<8x128xf32>, i32 -> vector<8x128xf32>
    %63 = vector.broadcast %21 : vector<1x128xf32> to vector<8x128xf32>
    %64 = arith.mulf %62, %63 : vector<8x128xf32>
    %65 = arith.addf %61, %64 : vector<8x128xf32>
    %66 = vector.extract_strided_slice %65 {offsets = [0, 0], sizes = [4, 128], strides = [1, 1]} : vector<8x128xf32> to vector<4x128xf32>
    %67 = vector.extract_strided_slice %65 {offsets = [4, 0], sizes = [4, 128], strides = [1, 1]} : vector<8x128xf32> to vector<4x128xf32>
    %cst_19 = arith.constant 5.000000e-01 : f32
    %68 = vector.broadcast %cst_19 : f32 to vector<4x128xf32>
    %69 = arith.mulf %68, %66 : vector<4x128xf32>
    %cst_20 = arith.constant 0.707106769 : f32
    %70 = vector.broadcast %cst_20 : f32 to vector<4x128xf32>
    %71 = arith.mulf %66, %70 : vector<4x128xf32>
    %72 = math.erf %71 : vector<4x128xf32>
    %cst_21 = arith.constant 1.000000e+00 : f32
    %73 = vector.broadcast %cst_21 : f32 to vector<4x128xf32>
    %74 = arith.addf %73, %72 : vector<4x128xf32>
    %75 = arith.mulf %69, %74 : vector<4x128xf32>
    %76 = arith.mulf %75, %67 : vector<4x128xf32>
    %c0_22 = arith.constant 0 : index
    %c0_23 = arith.constant 0 : index
    %77 = vector.load %arg8[%c0_22, %c0_23] : memref<4x4xbf16, #tpu.memory_space<vmem>>, vector<4x4xbf16>
    %78 = arith.truncf %76 : vector<4x128xf32> to vector<4x128xbf16>
    %cst_24 = arith.constant dense<0.000000e+00> : vector<4x128xf32>
    %79 = tpu.matmul %77, %78, %cst_24 {dimension_numbers = #tpu.dot_dimension_numbers<[1], [0], [0], [1], [0, 0, 1, 1], [], []>} : vector<4x4xbf16>, vector<4x128xbf16>, vector<4x128xf32> -> vector<4x128xf32>
    %c0_25 = arith.constant 0 : index
    %c0_26 = arith.constant 0 : index
    %c0_27 = arith.constant 0 : index
    %80 = vector.load %arg9[%c0_25, %c0_26, %c0_27] : memref<1x4x128xf32, #tpu.memory_space<vmem>>, vector<1x4x128xf32>
    %81 = vector.shape_cast %80 : vector<1x4x128xf32> to vector<4x128xf32>
    %82 = vector.shape_cast %79 : vector<4x128xf32> to vector<1x4x128xf32>
    tpu.vector_store %arg9[%c0_25, %c0_26, %c0_27], %82 {strides = array<i32>} : memref<1x4x128xf32, #tpu.memory_space<vmem>>, vector<1x4x128xf32>,
    return
  }
  func.func @transform_0(%arg0: i32, %arg1: i32) -> (i32, i32, i32) {
    %c0_i32 = arith.constant 0 : i32
    %c0_i32_0 = arith.constant 0 : i32
    return %arg0, %c0_i32, %arg1 : i32, i32, i32
  }
  func.func @transform_1(%arg0: i32, %arg1: i32) -> (i32, i32, i32) {
    %c1_i32 = arith.constant 1 : i32
    %0 = arith.muli %arg1, %c1_i32 : i32
    %c1_i32_0 = arith.constant 1 : i32
    %1 = arith.subi %0, %c1_i32_0 : i32
    %c0_i32 = arith.constant 0 : i32
    %2 = arith.maxsi %1, %c0_i32 : i32
    %c0_i32_1 = arith.constant 0 : i32
    %c0_i32_2 = arith.constant 0 : i32
    return %arg0, %c0_i32_1, %2 : i32, i32, i32
  }
  func.func @transform_2(%arg0: i32, %arg1: i32) -> (i32, i32, i32) {
    %c1_i32 = arith.constant 1 : i32
    %0 = arith.addi %arg1, %c1_i32 : i32
    %c1_i32_0 = arith.constant 1 : i32
    %1 = arith.muli %0, %c1_i32_0 : i32
    %c3_i32 = arith.constant 3 : i32
    %2 = arith.minsi %1, %c3_i32 : i32
    %c0_i32 = arith.constant 0 : i32
    %c0_i32_1 = arith.constant 0 : i32
    return %arg0, %c0_i32, %2 : i32, i32, i32
  }
  func.func @transform_3(%arg0: i32, %arg1: i32) -> (i32, i32) {
    %c0_i32 = arith.constant 0 : i32
    %c0_i32_0 = arith.constant 0 : i32
    %c0_i32_1 = arith.constant 0 : i32
    return %c0_i32, %c0_i32_0 : i32, i32
  }
  func.func @transform_4(%arg0: i32, %arg1: i32) -> (i32, i32) {
    %c0_i32 = arith.constant 0 : i32
    %c0_i32_0 = arith.constant 0 : i32
    %c0_i32_1 = arith.constant 0 : i32
    return %c0_i32, %c0_i32_0 : i32, i32
  }
  func.func @transform_5(%arg0: i32, %arg1: i32) -> (i32, i32) {
    %c0_i32 = arith.constant 0 : i32
    %c0_i32_0 = arith.constant 0 : i32
    %c0_i32_1 = arith.constant 0 : i32
    return %c0_i32, %c0_i32_0 : i32, i32
  }
  func.func @transform_6(%arg0: i32, %arg1: i32) -> (i32, i32) {
    %c0_i32 = arith.constant 0 : i32
    %c0_i32_0 = arith.constant 0 : i32
    %c0_i32_1 = arith.constant 0 : i32
    return %c0_i32, %c0_i32_0 : i32, i32
  }
  func.func @transform_7(%arg0: i32, %arg1: i32) -> (i32, i32, i32) {
    %c0_i32 = arith.constant 0 : i32
    %c0_i32_0 = arith.constant 0 : i32
    return %arg0, %c0_i32, %arg1 : i32, i32, i32
  }
}

</mosaic_0001>

<bundles_post_ra>
// kernel: squeeze.4
= control target key start
LH: loop header
LB: loop body
LE: loop exit
PB: predicated region body
PF: predicated region fallthrough
CT: control target
= control target key end

     0   :  { %vm16_vm0 = vcmask 64512   ;;  %s61_s0 = inlined_call_operand.vmem [shape: f32[8,3,3], index: 0, kind: input, shape index: {}]   ;;  %s62_s1 = inlined_call_operand.vmem [shape: f32[8,9], index: 1, kind: output, shape index: {}]  }
   0x1   :  { %v29_v0 = vld [vmem:[%s61_s0 + $0x8] sm:$0xf]  ;;  %v30_v1 = vld [vmem:[%s61_s0 + $0x4] sm:$0xf]  ;;  %v13_v2 = vld [vmem:[%s61_s0] sm:$0xf] }
   0x2   :  { %8 = vst [vmem:[#allocation0 + $0x10] sm:$0xf] %v29_v0  ;;  %12 = vst [vmem:[#allocation0 + $0x8] sm:$0xf] %v30_v1 }
   0x3   :  { %14 = vst [vmem:[#allocation0] sm:$0xf] %v13_v2 }
   0x9   :  { %v19_v4 = vld [vmem:[#allocation0 + $0x8] sm:$0x7]   ;;  %v24_v5 = vld [vmem:[#allocation0 + $0x10] sm:$0x7]  }
   0xa   :  { %v15_v3 = vld [vmem:[#allocation0] sm:$0x7]   ;;  %31 = vst.msk [vmem:[%s62_s1 + $0x3] sm:$0x7] %vm16_vm0, %v19_v4   ;;  %32 = vst.msk [vmem:[%s62_s1 + $0x6] sm:$0x7] %vm16_vm0, %v24_v5  }
   0xb   :  { %17 = vst.msk [vmem:[%s62_s1] sm:$0x7] %vm16_vm0, %v15_v3  }

// kernel: gated_feed_forward.1
= control target key start
LH: loop header
LB: loop body
LE: loop exit
PB: predicated region body
PF: predicated region fallthrough
CT: control target
= control target key end

     0   :  { %s1189_s24 = smov 0   ;;  %s1191_s25 = smov 0   ;;  %s1359_s0 = inlined_call_operand.vmem [shape: f32[2,4,512], index: 0, kind: input, shape index: {}, may-alias: {0,1,2}]   ;;  %s1360_s1 = inlined_call_operand.vmem [shape: f32[2,4,512], index: 1, kind: input, shape index: {}, may-alias: {0,1,2}]   ;;  %s1361_s2 = inlined_call_operand.vmem [shape: f32[2,4,512], index: 2, kind: input, shape index: {}, may-alias: {0,1,2}]   ;;  %s1362_s3 = inlined_call_operand.vmem [shape: f32[2,128], index: 3, kind: input, shape index: {}]   ;;  %s1363_s4 = inlined_call_operand.vmem [shape: bf16[8,4], index: 4, kind: input, shape index: {}]   ;;  %s1364_s5 = inlined_call_operand.vmem [shape: f32[8,9], index: 5, kind: input, shape index: {}]   ;;  %s1365_s6 = inlined_call_operand.vmem [shape: bf16[4,4], index: 6, kind: input, shape index: {}]   ;;  %s1366_s7 = inlined_call_operand.vmem [shape: f32[2,4,512], index: 7, kind: output, shape index: {}]  }
   0x1   :  { %s1193_s26 = smov 0   ;;  %s1195_s27 = smov 0  }
   0x2   :  { %s1197_s28 = smov 0  }
   0x3 LB: > { %s26_s29 = sadd.s32 1, %s1115_s26  ;;  %s29_s30 = sadd.s32 1, %s1119_s27  ;;  %s1123_s28 = sphi %s1197_s28, %s17_s28   ;;  %s1119_s27 = sphi %s1195_s27, %s1371_s27   ;;  %s1115_s26 = sphi %s1193_s26, %s1370_s26   ;;  %s1111_s25 = sphi %s1191_s25, %s1369_s25   ;;  %s1107_s24 = sphi %s1189_s24, %s1368_s24  }
   0x4   : > { %p27_p0 = scmp.ge.s32.totalorder %s26_s29, 4  ;;  %p945_p1 = scmp.ge.s32.totalorder %s1123_s28, 1 }
   0x5   : > { %p310_p2 = scmp.lt.s32.totalorder %s1123_s28, 9 }
   0x6   : > { %s1373_s29 = smov (%p27_p0, %s26_s29), 0  ;;  %s1375_s30 = smov (!%p27_p0, %s29_s30), %s1119_s27 }
   0x7   : > { %p311_p3 = pnand %p945_p1, %p310_p2  ;;  %p31_p4 = scmp.ge.s32.totalorder %s1375_s30, 2 }
   0x8   : > { %p370_p5 = scmp.lt.s32.totalorder (!%p311_p3), %s1111_s25, 1  ;;  %p372_p6 = scmp.lt.s32.totalorder (!%p311_p3), %s1107_s24, 3  ;;  %v1125_v0 = vmov (!%p311_p3), 0.0   ;;  %vm1126_vm0 = vmmov (!%p311_p3), 0   ;;  %vm422_vm1 = vcmask (!%p311_p3), 1041408   ;;  %vm418_vm2 = vcmask (!%p311_p3), 31744  }
   0x9   : > { %s1377_s30 = smov (%p31_p4, %s1375_s30), 0  ;;  %314 = sbr.rel (%p311_p3) target bundleno = 1782 (0x6f6), region = 48 }
   0xa   : > { %983 = vmatprep.subr.bf16.mxu0 (!%p311_p3), %v1125_v0  ;;  %s948_s8 = sadd.s32 (!%p311_p3), 4294967295, %s1107_s24  ;;  %s392_s9 = sadd.s32 (!%p311_p3), 1, %s1107_s24  ;;  %985 = vmatprep.mubr.msk.bf16.mxu0 (!%p311_p3), %vm1126_vm0, %v1125_v0  ;;  %v415_v4 = vld [vmem:[%s1363_s4] sm:$0xf] (!%p311_p3) }
   0xb   : > { %p379_p7 = scmp.gt.s32.totalorder (!%p311_p3), %s948_s8, 0  ;;  %p949_p8 = scmp.lt.s32.totalorder (!%p311_p3), %s948_s8, 3 }
   0xc   : > { %p1230_p9 = scmp.lt.s32.totalorder (!%p311_p3), %s392_s9, 3  ;;  %p964_p10 = scmp.le.s32.totalorder (!%p311_p3), %s1107_s24, 0 }
  0x10   : > { %s1379_s25 = smov (!%p370_p5, %s1111_s25), 1  ;;  %s1381_s8 = smov (!%p379_p7, %s948_s8), 0 }
  0x11   : > { %s373_s10 = scalar_select %p372_p6, %s1107_s24, 3 }
  0x12   : > { %s946_s11 = sshll.u32 %s1379_s25, 2  ;;  %s1383_s9 = smov (!%p1230_p9, %s392_s9), 3  ;;  %v1127_v11 = vmov (!%p964_p10), 0.0   ;;  %vm1128_vm3 = vmmov (!%p964_p10), 0   ;;  %vm523_vm4 = vcmask (!%p964_p10), 1048448  }
  0x13   : > { %s375_s12 = sadd.s32 %s946_s11, %s373_s10  ;;  %s1385_s8 = smov (!%p949_p8, %s1381_s8), 3 }
  0x14   : > { %s1228_s13 = sshll.u32 %s375_s12, 2  ;;  %s1387_s9 = smov (!%p1230_p9, %s1383_s9), 3 }
  0x15   : > { %s377_s17 = scalar_lea.vmem %s1359_s0, %s1228_s13  ;;  %s413_s20 = scalar_lea.vmem %s1366_s7, %s1228_s13 }
  0x16   : > { %v416_v1 = vld [vmem:[%s377_s17] sm:$0xf]  ;;  %s386_s21 = sadd.s32 %s1385_s8, %s946_s11  ;;  %s400_s10 = sadd.s32 %s946_s11, %s1387_s9 }
  0x17   : > { %v417_v2 = vpack.c.bf16 %v416_v1, %v416_v1  ;;  %s955_s25 = sshll.u32 %s386_s21, 2  ;;  %s960_s17 = sshll.u32 %s400_s10, 2 }
  0x18   : > { %s388_s16 = scalar_lea.vmem %s1360_s1, %s955_s25  ;;  %s1256_s14 = scalar_lea.vmem %s1361_s2, %s960_s17 }
  0x19   : > { %v424_v3 = vsel %vm422_vm1, %v417_v2, 0  ;;  %v471_v9 = vld [vmem:[%s388_s16] sm:$0xf] (!%p964_p10)  ;;  %s1129_s8 = smov (!%p964_p10), 16   ;;  %s1130_s9 = smov (!%p964_p10), 112  }
  0x1a   : > { %984 = vmatpush3.bf16.msra.mxu0 %v424_v3  ;;  %v472_v10 = vpack.c.bf16 (!%p964_p10), %v471_v9, %v471_v9 }
  0x1b   : > { %989 = vmatprep.subr.bf16.mxu0 (!%p964_p10), %v1127_v11 }
  0x1c   : > { %474 = vrot.lane.b32.xlu0 (!%p964_p10), %v472_v10, %s1129_s8 }
  0x1d   : > { %986 = vmatmul.mubr.msk.bf16.vlgmr.msra.gmra.mrb[0].mxu0 %vm418_vm2, %v415_v4 }
  0x1e   : > { %991 = vmatprep.mubr.msk.bf16.mxu0 (!%p964_p10), %vm1128_vm3, %v1127_v11 }
  0x8e   : > { %v475_v12 = vpop.permute.xlu0 (!%p964_p10), %474 }
  0x8f   : > { %v477_v13 = vsel (!%p964_p10), %vm422_vm1, %v475_v12, 0 }
  0x90   : > { %990 = vmatpush3.bf16.msra.mxu0 (!%p964_p10), %v477_v13 }
  0xed   : > { %470 = sbr.rel (%p964_p10) target bundleno = 571 (0x23b), region = 52 }
  0xf0   : > { %v460_v5 = vpop.f32.mrb[0].mxu0 }
  0xf1   : > { %466 = vst [vmem:[#allocation2 + $0x8] sm:$0xff] %v460_v5  ;;  %v987_v6 = vpop.f32.mrb[1].mxu0 }
  0xf2   : > { %v463_v7 = vpop.f32.mrb[2].mxu0 }
  0xf3   : > { %v988_v8 = vpop.f32.mrb[3].mxu0  ;;  %992 = vmatmul.mubr.msk.bf16.vlgmr.msra.gmra.mrb[0].mxu0 (!%p964_p10), %vm418_vm2, %v415_v4 }
 0x1c6   : > { %v513_v14 = vpop.f32.mrb[0].mxu0 }
 0x1c7   : > { %520 = vrot.lane.b32.xlu0 %v513_v14, %s1130_s9  ;;  %v993_v15 = vpop.f32.mrb[1].mxu0 }
 0x1c8   : > { %v516_v16 = vpop.f32.mrb[2].mxu0 }
 0x1c9   : > { %v994_v17 = vpop.f32.mrb[3].mxu0 }
 0x239   : > { %v521_v18 = vpop.permute.xlu0 %520 }
 0x23a   : > { %524 = vst.msk [vmem:[#allocation2] sm:$0xff] %vm523_vm4, %v521_v18 }
 0x23b PF: > { %p966_p11 = scmp.ne.s32.totalorder %s1107_s24, 0 }
 0x23c   : > { %vm529_vm5 = vcmask (!%p966_p11), 1048448   ;;  %v1131_v19 = vmov (!%p966_p11), 0.0  }
 0x23d   : > { %528 = sbr.rel (%p966_p11) target bundleno = 580 (0x244), region = 56  ;;  %530 = vst.msk [vmem:[#allocation2] sm:$0xff] (!%p966_p11), %vm529_vm5, %v1131_v19 }
 0x244 PF: > { %p967_p12 = scmp.ge.s32.totalorder %s1107_s24, 3 }
 0x245   : > { %v535_v20 = vld [vmem:[%s1256_s14] sm:$0xf] (!%p967_p12)  ;;  %v1132_v21 = vmov (!%p967_p12), 0.0   ;;  %vm1133_vm6 = vmmov (!%p967_p12), 0   ;;  %vm580_vm7 = vcmask (!%p967_p12), 130048  }
 0x246   : > { %534 = sbr.rel (%p967_p12) target bundleno = 803 (0x323), region = 60  ;;  %995 = vmatprep.subr.bf16.mxu0 (!%p967_p12), %v1132_v21  ;;  %v536_v22 = vpack.c.bf16 (!%p967_p12), %v535_v20, %v535_v20  ;;  %997 = vmatprep.mubr.msk.bf16.mxu0 (!%p967_p12), %vm1133_vm6, %v1132_v21 }
 0x248   : > { %v538_v23 = vsel (!%p967_p12), %vm422_vm1, %v536_v22, 0 }
 0x249   : > { %996 = vmatpush3.bf16.msra.mxu0 (!%p967_p12), %v538_v23 }
 0x24c   : > { %998 = vmatmul.mubr.msk.bf16.vlgmr.msra.gmra.mrb[0].mxu0 (!%p967_p12), %vm418_vm2, %v415_v4 }
 0x31f   : > { %v574_v24 = vpop.f32.mrb[0].mxu0 }
 0x320   : > { %581 = vst.msk [vmem:[#allocation2 + $0x10] sm:$0xff] %vm580_vm7, %v574_v24  ;;  %v999_v25 = vpop.f32.mrb[1].mxu0 }
 0x321   : > { %v577_v26 = vpop.f32.mrb[2].mxu0 }
 0x322   : > { %v1000_v27 = vpop.f32.mrb[3].mxu0 }
 0x323 PF: > { %p969_p13 = scmp.ne.s32.totalorder %s1107_s24, 3 }
 0x324   : > { %vm586_vm8 = vcmask (!%p969_p13), 130048   ;;  %v1134_v28 = vmov (!%p969_p13), 0.0  }
 0x325   : > { %585 = sbr.rel (%p969_p13) target bundleno = 812 (0x32c), region = 64  ;;  %587 = vst.msk [vmem:[#allocation2 + $0x10] sm:$0xff] (!%p969_p13), %vm586_vm8, %v1134_v28 }
 0x32c PF: > { %v1271_v29 = vld [vmem:[%s1364_s5] sm:$0xff]  ;;  %1001 = vmatprep.subr.bf16.mxu0 %v1125_v0  ;;  %1003 = vmatprep.mubr.msk.bf16.mxu0 %vm1126_vm0, %v1125_v0  ;;  %v1135_v30 = vmov 3   ;;  %v1136_v31 = vmov 5   ;;  %v1137_v32 = vmov 6   ;;  %v1138_v33 = vmov 8   ;;  %v1283_v36 = vld [vmem:[#allocation2 + $0x8] sm:$0xff] }
 0x32d   : > { %1071 = vset.pattern.permute.xlu0 %v1135_v30  ;;  %1073 = vset.pattern.permute.xlu1 %v1136_v31  ;;  %v1139_v34 = vmov 0   ;;  %v1140_v35 = vmov 2   ;;  %s1141_s24 = smov 112   ;;  %v1287_v40 = vld [vmem:[#allocation2 + $0x10] sm:$0xff]  ;;  %s1142_s22 = smov 96   ;;  %v1143_v47 = vmov 4   ;;  %v709_v21 = vlaneseq }
 0x32e   : > { %617 = vperm.xlu0 %1071, %v1271_v29   ;;  %622 = vperm.xlu1 %1073, %v1271_v29   ;;  %v1144_v48 = vmov 7   ;;  %v1299_v51 = vld [vmem:[#allocation2] sm:$0xff]  ;;  %vm670_vm9 = vcmask 785408   ;;  %s1145_s23 = smov 16   ;;  %v1146_v9 = vmov 1   ;;  %vm704_vm10 = vcmask 130048  }
 0x32f   : > { %s1147_s25 = smov 1   ;;  %s1148_s10 = smov 127   ;;  %v710_v22 = vshrl.u32 %v709_v21, 7  ;;  %v589_v24 = vld [vmem:[%s1362_s3] sm:$0x3] }
 0x331   : > { %v711_v23 = vsub.s32 0, %v710_v22  ;;  %v732_v28 = vsub.s32 1, %v710_v22 }
 0x332   : > { %1072 = vset.pattern.permute.xlu0 %v1137_v32  ;;  %1074 = vset.pattern.permute.xlu1 %v1138_v33 }
 0x333   : > { %653 = vperm.xlu0 %1072, %v1271_v29   ;;  %659 = vperm.xlu1 %1074, %v1271_v29   ;;  %v712_v25 = vrot.slane %v589_v24, %v711_v23 }
 0x337   : > { %1075 = vset.pattern.permute.xlu1 %v1139_v34  ;;  %1076 = vset.pattern.permute.xlu0 %v1140_v35 }
 0x338   : > { %600 = vperm.xlu1 %1075, %v1271_v29   ;;  %606 = vperm.xlu0 %1076, %v1271_v29  }
 0x33c   : > { %1077 = vset.pattern.permute.xlu0 %v1143_v47  ;;  %1078 = vset.pattern.permute.xlu1 %v1144_v48 }
 0x3ad   : > { %v618_v37 = vpop.permute.xlu0 %617  ;;  %v623_v38 = vpop.permute.xlu1 %622 }
 0x3ae   : > { %v620_v39 = vmul.f32 %v618_v37, %v1283_v36  ;;  %v625_v45 = vmul.f32 %v623_v38, %v1283_v36 }
 0x3b0   : > { %633 = vrot.lane.b32.xlu1 %v620_v39, %s1141_s24 }
 0x3b2   : > { %v654_v41 = vpop.permute.xlu0 %653  ;;  %v660_v42 = vpop.permute.xlu1 %659 }
 0x3b3   : > { %v656_v43 = vmul.f32 %v654_v41, %v1283_v36  ;;  %v657_v44 = vmul.f32 %v654_v41, %v1287_v40  ;;  %v662_v46 = vmul.f32 %v660_v42, %v1283_v36  ;;  %v663_v49 = vmul.f32 %v660_v42, %v1287_v40 }
 0x3b5   : > { %680 = vrot.lane.b32.xlu0 %v657_v44, %s1142_s22  ;;  %678 = vrot.lane.b32.xlu1 %v656_v43, %s1142_s22 }
 0x3b7   : > { %v601_v50 = vpop.permute.xlu1 %600  ;;  %v607_v52 = vpop.permute.xlu0 %606 }
 0x3b8   : > { %v603_v53 = vmul.f32 %v601_v50, %v1299_v51  ;;  %v604_v55 = vmul.f32 %v601_v50, %v1283_v36  ;;  %v609_v63 = vmul.f32 %v607_v52, %v1299_v51  ;;  %v610_v3 = vmul.f32 %v607_v52, %v1283_v36 }
 0x3b9   : > { %639 = vrot.lane.b32.xlu1 %v625_v45, %s1141_s24  ;;  %689 = vrot.lane.b32.xlu0 %v662_v46, %s1142_s22 }
 0x3bd   : > { %691 = vrot.lane.b32.xlu1 %v663_v49, %s1142_s22 }
 0x422   : > { %v634_v54 = vpop.permute.xlu1 %633 }
 0x423   : > { %v636_v56 = vadd.f32 %v634_v54, %v603_v53  ;;  %v637_v57 = vadd.f32 %v634_v54, %v604_v55 }
 0x427   : > { %v679_v58 = vpop.permute.xlu1 %678  ;;  %v681_v59 = vpop.permute.xlu0 %680 }
 0x428   : > { %v685_v60 = vadd.f32 %v679_v58, %v636_v56  ;;  %v682_v61 = vsel %vm670_vm9, %v679_v58, %v681_v59 }
 0x429   : > { %v686_v62 = vadd.f32 %v682_v61, %v637_v57 }
 0x42a   : > { %700 = vrot.lane.b32.xlu0 %v685_v60, %s1145_s23 }
 0x42b   : > { %v640_v0 = vpop.permute.xlu1 %639  ;;  %702 = vrot.lane.b32.xlu1 %v686_v62, %s1145_s23  ;;  %v690_v1 = vpop.permute.xlu0 %689 }
 0x42c   : > { %v642_v2 = vadd.f32 %v640_v0, %v609_v63  ;;  %v643_v5 = vadd.f32 %v640_v0, %v610_v3 }
 0x42e   : > { %v696_v4 = vadd.f32 %v690_v1, %v642_v2 }
 0x42f   : > { %v692_v6 = vpop.permute.xlu1 %691 }
 0x430   : > { %v693_v7 = vsel %vm670_vm9, %v690_v1, %v692_v6  ;;  %722 = vrot.lane.b32.xlu0 %v696_v4, %s1145_s23 }
 0x431   : > { %v697_v8 = vadd.f32 %v693_v7, %v643_v5  ;;  %v759_v5 = vld [vmem:[%s1365_s6] sm:$0x3] }
 0x433   : > { %724 = vrot.lane.b32.xlu1 %v697_v8, %s1145_s23 }
 0x434   : > { %612 = vperm.xlu0 %1077, %v1271_v29  }
 0x437   : > { %647 = vperm.xlu1 %1078, %v1271_v29  }
 0x438   : > { %1080 = vset.pattern.permute.xlu0 %v1138_v33 }
 0x43b   : > { %1079 = vset.pattern.permute.xlu1 %v1146_v9 }
 0x49c   : > { %v701_v10 = vpop.permute.xlu0 %700 }
 0x49d   : > { %v703_v11 = vpop.permute.xlu1 %702 }
 0x49e   : > { %v705_v12 = vsel %vm704_vm10, %v701_v10, %v703_v11 }
 0x49f   : > { %707 = vrot.lane.b32.xlu1 %v705_v12, %s1147_s25 }
 0x4a2   : > { %v723_v13 = vpop.permute.xlu0 %722 }
 0x4a3   : > { %594 = vperm.xlu1 %1079, %v1271_v29   ;;  %v733_v29 = vrot.slane %v589_v24, %v732_v28 }
 0x4a5   : > { %v725_v14 = vpop.permute.xlu1 %724 }
 0x4a6   : > { %v726_v15 = vsel %vm704_vm10, %v723_v13, %v725_v14 }
 0x4a7   : > { %728 = vrot.lane.b32.xlu0 %v726_v15, %s1148_s10 }
 0x4b3   : > { %v613_v16 = vpop.permute.xlu0 %612 }
 0x4b4   : > { %v615_v17 = vmul.f32 %v613_v16, %v1283_v36 }
 0x4b6   : > { %v648_v18 = vpop.permute.xlu1 %647  ;;  %627 = vrot.lane.b32.xlu0 %v615_v17, %s1141_s24 }
 0x4b7   : > { %v650_v19 = vmul.f32 %v648_v18, %v1283_v36  ;;  %v651_v20 = vmul.f32 %v648_v18, %v1287_v40 }
 0x4b9   : > { %666 = vrot.lane.b32.xlu1 %v650_v19, %s1142_s22 }
 0x4ba   : > { %668 = vrot.lane.b32.xlu0 %v651_v20, %s1142_s22 }
 0x511   : > { %v708_v26 = vpop.permute.xlu1 %707 }
 0x512   : > { %v713_v27 = vmul.f32 %v712_v25, %v708_v26 }
 0x514   : > { %715 = vrot.lane.b32.xlu1 %v713_v27, %s1141_s24 }
 0x519   : > { %v729_v30 = vpop.permute.xlu0 %728 }
 0x51a   : > { %v734_v31 = vmul.f32 %v733_v29, %v729_v30 }
 0x51c   : > { %736 = vrot.lane.b32.xlu0 %v734_v31, %s1141_s24 }
 0x522   : > { %v595_v32 = vpop.permute.xlu1 %594 }
 0x523   : > { %v597_v34 = vmul.f32 %v595_v32, %v1299_v51  ;;  %v598_v35 = vmul.f32 %v595_v32, %v1283_v36 }
 0x528   : > { %v628_v33 = vpop.permute.xlu0 %627 }
 0x529   : > { %v630_v39 = vadd.f32 %v628_v33, %v597_v34  ;;  %v631_v40 = vadd.f32 %v628_v33, %v598_v35 }
 0x52b   : > { %v667_v37 = vpop.permute.xlu1 %666 }
 0x52c   : > { %v669_v38 = vpop.permute.xlu0 %668  ;;  %v674_v42 = vadd.f32 %v667_v37, %v630_v39 }
 0x52d   : > { %v671_v41 = vsel %vm670_vm9, %v667_v37, %v669_v38 }
 0x52e   : > { %v675_v43 = vadd.f32 %v671_v41, %v631_v40 }
 0x586   : > { %v716_v44 = vpop.permute.xlu1 %715 }
 0x587   : > { %v718_v45 = vadd.f32 %v716_v44, %v674_v42  ;;  %v719_v46 = vadd.f32 %v716_v44, %v675_v43 }
 0x58e   : > { %v737_v47 = vpop.permute.xlu0 %736 }
 0x58f   : > { %v739_v48 = vadd.f32 %v737_v47, %v718_v45  ;;  %v740_v49 = vadd.f32 %v737_v47, %v719_v46 }
 0x591   : > { %v743_v50 = vmul.f32 0.70710677, %v739_v48  ;;  %v744_v52 = vmul.f32 0.70710677, %v740_v49  ;;  %v741_v53 = vmul.f32 0.5, %v739_v48  ;;  %v742_v55 = vmul.f32 0.5, %v740_v49 }
 0x592   : > { %v753_v57 = vrot.slane %v739_v48, 4  ;;  %v754_v59 = vrot.slane %v740_v49, 4 }
 0x593   : > { %1081 = verf.f32 %v743_v50 }
 0x594   : > { %1083 = verf.f32 %v744_v52 }
 0x59d   : > { %v1082_v51 = vpop.eup %1081 }
 0x59e   : > { %v1084_v36 = vpop.eup %1083  ;;  %v747_v54 = vadd.f32 1.0, %v1082_v51 }
 0x59f   : > { %v748_v56 = vadd.f32 1.0, %v1084_v36 }
 0x5a0   : > { %v749_v58 = vmul.f32 %v747_v54, %v741_v53 }
 0x5a1   : > { %v750_v60 = vmul.f32 %v748_v56, %v742_v55 }
 0x5a2   : > { %v757_v61 = vmul.f32 %v753_v57, %v749_v58 }
 0x5a3   : > { %v758_v62 = vmul.f32 %v754_v59, %v750_v60 }
 0x5a4   : > { %v760_v63 = vpack.c.bf16 %v757_v61, %v757_v61 }
 0x5a5   : > { %v761_v0 = vpack.c.bf16 %v758_v62, %v758_v62 }
 0x5a6   : > { %764 = vrot.lane.b32.xlu1 %v760_v63, %s1145_s23 }
 0x5a7   : > { %766 = vrot.lane.b32.xlu0 %v761_v0, %s1145_s23 }
 0x618   : > { %v765_v1 = vpop.permute.xlu1 %764 }
 0x619   : > { %v767_v2 = vpop.permute.xlu0 %766 }
 0x61a   : > { %v769_v3 = vsel %vm704_vm10, %v765_v1, %v767_v2 }
 0x61b   : > { %v774_v4 = vsel %vm422_vm1, %v769_v3, 0 }
 0x61c   : > { %1002 = vmatpush3.bf16.msra.mxu0 %v774_v4 }
 0x61f   : > { %1004 = vmatmul.mubr.msk.bf16.vlgmr.msra.gmra.mrb[0].mxu0 %vm418_vm2, %v759_v5 }
 0x6f2   : > { %v810_v6 = vpop.f32.mrb[0].mxu0 }
 0x6f3   : > { %816 = vst [vmem:[%s413_s20] sm:$0xf] %v810_v6  ;;  %v1005_v7 = vpop.f32.mrb[1].mxu0 }
 0x6f4   : > { %v813_v8 = vpop.f32.mrb[2].mxu0 }
 0x6f5   : > { %v1006_v9 = vpop.f32.mrb[3].mxu0 }
 0x6f6 PF: > { %s17_s28 = sadd.s32 1, %s1123_s28   ;;  %s1368_s24 = smov %s1115_s26 }
 0x6f7   : > { %p14_p0 = scmp.ge.s32.totalorder %s17_s28, 10   ;;  %s1369_s25 = smov %s1119_s27 }
 0x6f8   : > { %s1370_s26 = smov %s1373_s29  ;;  %s1371_s27 = smov %s1377_s30 }
 0x6f9   :  { %16 = sbr.rel (!%p14_p0) target bundleno = 3 (0x3), region = 100 }

</bundles_post_ra>
